<compile_context>
chip_gen: v6e
topology: v6e:2x2x1
jax: 0.10.0
libtpu: 0.0.40
codegen_flags: <defaults>
</compile_context>

<pallas_src>
import functools

import jax
import jax.numpy as jnp
from jax.experimental import pallas as pl
from jax.experimental.pallas import tpu as pltpu


def _label_smoothing_kernel(x_ref, xt_ref, loss_ref, *, confidence, smoothing):
    """Fused per-row smoothed NLL; log-probs and weight matrices never materialize."""
    x = x_ref[...]                                                    # (tn, C) input dtype
    n_classes = x.shape[-1]

    # Row max in the input dtype (exact in bf16, native bf16 VALU on v6e/v7x),
    # upcast only for the exp / accumulation path.
    m = jnp.max(x, axis=-1, keepdims=True).astype(jnp.float32)        # (tn, 1)
    shifted = x.astype(jnp.float32) - m                               # (tn, C) f32
    sum_exp = jnp.sum(jnp.exp(shifted), axis=-1, keepdims=True)       # (tn, 1)
    sum_shift = jnp.sum(shifted, axis=-1, keepdims=True)              # (tn, 1)

    nll = xt_ref[...] - m                                             # (tn, 1) = x_t - m
    loss_ref[...] = (
        jnp.log(sum_exp)
        - jnp.float32(confidence) * nll
        - jnp.float32(smoothing / n_classes) * sum_shift
    )


def _round_up(x, m):
    return ((x + m - 1) // m) * m


def label_smoothing_loss(x, target, smoothing=0.1, *, block_rows=None):
    """x: (N, C) float logits (f32 or bf16), target: (N,) int labels. Returns scalar loss."""
    N, C = x.shape
    confidence = 1.0 - smoothing

    x_bytes = jnp.dtype(x.dtype).itemsize
    sublane = {1: 32, 2: 16, 4: 8}.get(x_bytes, 8)

    # Generation-aware VMEM (v7x: 64 MiB physical, v5e/v6e: 128 MiB).
    try:
        vmem_cap = int(pltpu.get_tpu_info().vmem_capacity_bytes)
    except Exception:  # pragma: no cover - conservative (v7x-sized) fallback
        vmem_cap = 64 * 1024 * 1024

    if block_rows is None:
        # ~4 MiB of logits per block (amortizes the ~0.35 us/grid-step overhead),
        # clamped by a v7x-safe VMEM estimate: 2x double-buffered input stream plus
        # ~8 B/elem of f32 temporaries (shifted, exp), with budget = vmem_cap / 3.
        per_row_bytes = C * (2 * x_bytes + 12) + 64
        rows_vmem = max(sublane, (vmem_cap // 3) // per_row_bytes)
        rows_4mib = max(sublane, (4 * 1024 * 1024) // (C * x_bytes))
        block_rows = min(rows_vmem, rows_4mib)
    block_rows = max(sublane, min(int(block_rows), _round_up(N, sublane)))
    block_rows = _round_up(block_rows, sublane)

    n_blocks = pl.cdiv(N, block_rows)  # ragged tail handled by Pallas (no jnp.pad copy)

    # Hoisted target-logit gather: tiny (N, 1) f32 side input.
    xt = jnp.take_along_axis(
        x, target.astype(jnp.int32)[:, None], axis=-1
    ).astype(jnp.float32)

    kernel = functools.partial(
        _label_smoothing_kernel, confidence=confidence, smoothing=smoothing
    )

    vmem_limit = int(min(vmem_cap, max(32 * 1024 * 1024, (vmem_cap * 3) // 4)))

    losses = pl.pallas_call(
        kernel,
        out_shape=jax.ShapeDtypeStruct((N, 1), jnp.float32),
        grid_spec=pltpu.PrefetchScalarGridSpec(
            num_scalar_prefetch=0,
            grid=(n_blocks,),
            in_specs=[
                pl.BlockSpec((block_rows, C), lambda i: (i, 0)),
                pl.BlockSpec((block_rows, 1), lambda i: (i, 0)),
            ],
            out_specs=pl.BlockSpec((block_rows, 1), lambda i: (i, 0)),
        ),
        compiler_params=pltpu.CompilerParams(
            dimension_semantics=("parallel",),   # independent row blocks -> megacore
            vmem_limit_bytes=vmem_limit,
        ),
    )(x, xt)

    # Tiny final mean in XLA (all N rows are real; OOB tail writes were dropped).
    return jnp.sum(losses) / jnp.float32(N)


def _reference(x, target, smoothing):
    confidence = 1.0 - smoothing
    logp = jax.nn.log_softmax(x.astype(jnp.float32), axis=-1)
    nll = -jnp.take_along_axis(logp, target[:, None].astype(jnp.int32), axis=-1)[:, 0]
    smooth = -jnp.mean(logp, axis=-1)
    return jnp.mean(confidence * nll + smoothing * smooth)


if __name__ == "__main__":
    smoothing = 0.1
    k1, k2, k3, k4 = jax.random.split(jax.random.PRNGKey(0), 4)

    # Case 1: small f32 logits, single tile.
    N, C = 8, 32
    x = jax.random.normal(k1, (N, C), dtype=jnp.float32)
    target = jax.random.randint(k2, (N,), 0, C, dtype=jnp.int32)
    loss = jax.block_until_ready(label_smoothing_loss(x, target, smoothing=smoothing))
    ref = _reference(x, target, smoothing)
    assert jnp.allclose(loss, ref, atol=1e-5, rtol=1e-5), (loss, ref)

    # Case 2: bf16 logits, N not a block multiple -> ragged tail block, multi-step grid.
    N2, C2 = 37, 128
    x2 = jax.random.normal(k3, (N2, C2), dtype=jnp.bfloat16)
    target2 = jax.random.randint(k4, (N2,), 0, C2, dtype=jnp.int32)
    loss2 = jax.block_until_ready(
        label_smoothing_loss(x2, target2, smoothing=smoothing, block_rows=16)
    )
    ref2 = _reference(x2, target2, smoothing)
    assert jnp.allclose(loss2, ref2, atol=2e-3, rtol=2e-3), (loss2, ref2)

    # Case 3: auto tile sizing path (block_rows=None) on a slightly larger problem.
    N3, C3 = 130, 256
    x3 = jax.random.normal(k1, (N3, C3), dtype=jnp.float32)
    target3 = jax.random.randint(k2, (N3,), 0, C3, dtype=jnp.int32)
    loss3 = jax.block_until_ready(label_smoothing_loss(x3, target3, smoothing=smoothing))
    ref3 = _reference(x3, target3, smoothing)
    assert jnp.allclose(loss3, ref3, atol=1e-5, rtol=1e-5), (loss3, ref3)

    print("KERNEL_OK")
</pallas_src>

<mosaic_0001>
module attributes {stable_mosaic.version = 11 : i64} {
  func.func @_label_smoothing_kernel(%arg0: i32, %arg1: memref<8x32xf32, #tpu.memory_space<vmem>>, %arg2: memref<8x1xf32, #tpu.memory_space<vmem>>, %arg3: memref<8x1xf32, #tpu.memory_space<vmem>>) attributes {dimension_semantics = [#tpu.dimension_semantics<parallel>], iteration_bounds = array<i64: 1>, scalar_prefetch = 0 : i64, scratch_operands = 0 : i64, tpu.core_type = #tpu.core_type<tc>, window_params = [{transform_indices = @transform_0, window_bounds = array<i64: 8, 32>}, {transform_indices = @transform_1, window_bounds = array<i64: 8, 1>}, {transform_indices = @transform_2, window_bounds = array<i64: 8, 1>}]} {
    %c0 = arith.constant 0 : index
    %c0_0 = arith.constant 0 : index
    %0 = vector.load %arg1[%c0, %c0_0] : memref<8x32xf32, #tpu.memory_space<vmem>>, vector<8x32xf32>
    %cst = arith.constant dense<0xFF800000> : vector<8xf32>
    %1 = vector.multi_reduction <maximumf>, %0, %cst [1] : vector<8x32xf32> to vector<8xf32>
    %2 = vector.shape_cast %1 : vector<8xf32> to vector<8x1xf32>
    %3 = vector.broadcast %2 : vector<8x1xf32> to vector<8x32xf32>
    %4 = arith.subf %0, %3 : vector<8x32xf32>
    %5 = math.exp %4 : vector<8x32xf32>
    %cst_1 = arith.constant dense<0.000000e+00> : vector<8xf32>
    %6 = vector.multi_reduction <add>, %5, %cst_1 [1] : vector<8x32xf32> to vector<8xf32>
    %7 = vector.shape_cast %6 : vector<8xf32> to vector<8x1xf32>
    %cst_2 = arith.constant dense<0.000000e+00> : vector<8xf32>
    %8 = vector.multi_reduction <add>, %4, %cst_2 [1] : vector<8x32xf32> to vector<8xf32>
    %9 = vector.shape_cast %8 : vector<8xf32> to vector<8x1xf32>
    %c0_3 = arith.constant 0 : index
    %c0_4 = arith.constant 0 : index
    %10 = vector.load %arg2[%c0_3, %c0_4] : memref<8x1xf32, #tpu.memory_space<vmem>>, vector<8x1xf32>
    %11 = arith.subf %10, %2 : vector<8x1xf32>
    %12 = math.log %7 : vector<8x1xf32>
    %cst_5 = arith.constant 0.899999976 : f32
    %13 = vector.broadcast %cst_5 : f32 to vector<8x1xf32>
    %14 = arith.mulf %13, %11 : vector<8x1xf32>
    %15 = arith.subf %12, %14 : vector<8x1xf32>
    %cst_6 = arith.constant 3.125000e-03 : f32
    %16 = vector.broadcast %cst_6 : f32 to vector<8x1xf32>
    %17 = arith.mulf %16, %9 : vector<8x1xf32>
    %18 = arith.subf %15, %17 : vector<8x1xf32>
    %c0_7 = arith.constant 0 : index
    %c0_8 = arith.constant 0 : index
    %19 = vector.load %arg3[%c0_7, %c0_8] : memref<8x1xf32, #tpu.memory_space<vmem>>, vector<8x1xf32>
    tpu.vector_store %arg3[%c0_7, %c0_8], %18 {strides = array<i32>} : memref<8x1xf32, #tpu.memory_space<vmem>>, vector<8x1xf32>,
    return
  }
  func.func @transform_0(%arg0: i32) -> (i32, i32) {
    %c0_i32 = arith.constant 0 : i32
    %c0_i32_0 = arith.constant 0 : i32
    return %arg0, %c0_i32 : i32, i32
  }
  func.func @transform_1(%arg0: i32) -> (i32, i32) {
    %c0_i32 = arith.constant 0 : i32
    %c0_i32_0 = arith.constant 0 : i32
    return %arg0, %c0_i32 : i32, i32
  }
  func.func @transform_2(%arg0: i32) -> (i32, i32) {
    %c0_i32 = arith.constant 0 : i32
    %c0_i32_0 = arith.constant 0 : i32
    return %arg0, %c0_i32 : i32, i32
  }
}

</mosaic_0001>

<bundles_post_ra>
// kernel: tpu_custom_call.1
= control target key start
LH: loop header
LB: loop body
LE: loop exit
PB: predicated region body
PF: predicated region fallthrough
CT: control target
= control target key end

     0   :  { %vm12_vm0 = vcmask 261120   ;;  %vm33_vm1 = vcmask 7168   ;;  %s67_s0 = inlined_call_operand.vmem [shape: f32[8,32], index: 0, kind: input, shape index: {}]   ;;  %s68_s1 = inlined_call_operand.vmem [shape: f32[8,1], index: 1, kind: input, shape index: {}]   ;;  %s69_s2 = inlined_call_operand.vmem [shape: f32[8,1], index: 2, kind: output, shape index: {}]  }
   0x1   :  { %v11_v0 = vld [vmem:[%s67_s0] sm:$0xff] }
   0x2   :  { %v13_v1 = vsel %vm12_vm0, %v11_v0, -inf  ;;  %v25_v9 = vld [vmem:[%s68_s1] sm:$0xff] }
   0x3   :  { %14 = vmax.xlane.f32.xlu0 %v13_v1 }
  0x8c   :  { %v15_v2 = vpop.xlane.xlu0 %14 }
  0x8d   :  { %v16_v3 = vsub.f32 %v11_v0, %v15_v2  ;;  %v26_v10 = vsub.f32 %v25_v9, %v15_v2 }
  0x8f   :  { %v22_v4 = vsel %vm12_vm0, %v16_v3, 0.0  ;;  %v17_v5 = vmul.f32 1.442695, %v16_v3  ;;  %v29_v13 = vmul.f32 0.9, %v26_v10 }
  0x90   :  { %23 = vadd.xlane.f32.xlu1 %v22_v4 }
  0x91   :  { %39 = vpow2.f32 %v17_v5 }
  0x9e   :  { %v40_v6 = vpop.eup %39 }
  0x9f   :  { %v19_v7 = vsel %vm12_vm0, %v40_v6, 0.0 }
  0xa0   :  { %20 = vadd.xlane.f32.xlu0 %v19_v7 }
 0x119   :  { %v24_v12 = vpop.xlane.xlu1 %23 }
 0x11a   :  { %v31_v15 = vmul.f32 0.003125, %v24_v12 }
 0x129   :  { %v21_v8 = vpop.xlane.xlu0 %20 }
 0x12a   :  { %41 = vlog2.f32 %v21_v8 }
 0x137   :  { %v42_v11 = vpop.eup %41 }
 0x138   :  { %v28_v14 = vmul.f32 0.6931472, %v42_v11 }
 0x13a   :  { %v30_v16 = vsub.f32 %v28_v14, %v29_v13 }
 0x13c   :  { %v32_v17 = vsub.f32 %v30_v16, %v31_v15 }
 0x13e   :  { %34 = vst.msk [vmem:[%s69_s2] sm:$0xff] %vm33_vm1, %v32_v17 }

</bundles_post_ra>
